<compile_context>
chip_gen: v7x
topology: tpu7x:2x2x1
jax: 0.10.0
libtpu: 0.0.40
codegen_flags: <defaults>
</compile_context>

<pallas_src>
import functools

import jax
import jax.numpy as jnp
from jax import lax
from jax.experimental import pallas as pl
from jax.experimental.pallas import tpu as pltpu


def _kmax_pool_height(acc, k):
    """Top-k along axis 0 of (Ho, L), keeping original row order.

    Matches torch `topk(k, dim).indices.sort(dim).values` then `gather` (ties broken by
    lowest index, the same convention as lax.top_k)."""
    Ho, L = acc.shape
    iota_h = lax.broadcasted_iota(jnp.int32, (Ho, L), 0).astype(jnp.float32)
    sentinel = jnp.float32(Ho)

    masked = acc
    idxs, vals = [], []
    for _ in range(k):
        m = jnp.max(masked, axis=0, keepdims=True)                 # (1, L)
        cand = jnp.where(masked == m, iota_h, sentinel)
        first = jnp.min(cand, axis=0, keepdims=True)               # earliest index among ties
        idxs.append(first)
        vals.append(m)
        masked = jnp.where(iota_h == first, -jnp.inf, masked)

    # Scatter the k picks back into ascending-original-index order.
    # slot_p = #{q : idx_q < idx_p}  (all selected indices are distinct)
    row_iota = lax.broadcasted_iota(jnp.int32, (k, L), 0).astype(jnp.float32)
    pooled = jnp.zeros((k, L), jnp.float32)
    for p in range(k):
        slot = jnp.zeros_like(idxs[p])
        for q in range(k):
            if q != p:
                slot = slot + (idxs[q] < idxs[p]).astype(jnp.float32)
        pooled = pooled + jnp.where(row_iota == slot, vals[p], 0.0)
    return pooled


def _ccpm_fused_kernel(*refs, layer_specs, band_offs, sub, n_sub):
    # refs = (x_ref, w_0, b_0, ..., w_{n-1}, b_{n-1}, out_ref, act_ref)
    #   x_ref   : (1, F, L)                VMEM  (batch*emb packed on the lane axis)
    #   w_i     : (Co_i*Ci_i*kh_i,)        SMEM  flattened conv weights (width kernel == 1)
    #   b_i     : (Co_i,)                  SMEM
    #   out_ref : (Co_last*k_last, L)      VMEM  flattened lane-dense output slab
    #   act_ref : (sum_i Ci_i, Hp_max, L)  VMEM  zero-padded activation bands (one per layer)
    n_layers = len(layer_specs)
    x_ref = refs[0]
    wb = refs[1:1 + 2 * n_layers]
    out_ref = refs[1 + 2 * n_layers]
    act_ref = refs[2 + 2 * n_layers]

    F = x_ref.shape[1]

    def lane_body(c, carry):
        lo = pl.multiple_of(c * sub, sub)           # sub is a multiple of 128
        lanes = pl.ds(lo, sub)

        H = F
        for li, (ci_n, co_n, kh, k) in enumerate(layer_specs):
            w_ref, b_ref = wb[2 * li], wb[2 * li + 1]
            off = band_offs[li]
            Hp = H + 2 * (kh - 1)
            Ho = H + kh - 1

            # ---- ZeroPad2d((0, 0, kh-1, kh-1)): zero only the halo rows of this band.
            # Done every step/sub-chunk (cheap) for megacore safety: scratch is per-core
            # and the second core never runs program_id == 0.
            if kh > 1:
                halo = jnp.zeros((kh - 1, sub), jnp.float32)
                for ci in range(ci_n):
                    act_ref[off + ci, 0:kh - 1, lanes] = halo
                    act_ref[off + ci, kh - 1 + H:Hp, lanes] = halo

            if li == 0:
                # Interior rows of band 0 come straight from the input block.
                act_ref[off, kh - 1:kh - 1 + H, lanes] = (
                    x_ref[0, :, lanes].astype(jnp.float32))
            # For li > 0 the interior rows were written by the previous layer below.

            kh_next = layer_specs[li + 1][2] if li + 1 < n_layers else None

            for co in range(co_n):
                # ---- Conv2d with kernel (kh, 1): one accumulator live; shifted slices
                # are re-read from VMEM per (ci, dh) instead of being hoisted (no spills).
                acc = jnp.full((Ho, sub), b_ref[co], dtype=jnp.float32)
                for ci in range(ci_n):
                    for dh in range(kh):
                        w = w_ref[(co * ci_n + ci) * kh + dh]
                        acc = acc + w * act_ref[off + ci, dh:dh + Ho, lanes]

                # ---- KMaxPooling(k, dim=2) preserving original order, then Tanh ----
                y = jnp.tanh(_kmax_pool_height(acc, k))            # (k, sub) f32

                if li == n_layers - 1:
                    # Lane-dense store into the flattened output slab.
                    out_ref[co * k:(co + 1) * k, lanes] = y.astype(out_ref.dtype)
                else:
                    # Stage through VMEM: write the interior rows of the next layer's band.
                    nb = band_offs[li + 1]
                    act_ref[nb + co, kh_next - 1:kh_next - 1 + k, lanes] = y
            H = k
        return carry

    lax.fori_loop(0, n_sub, lane_body, 0)


def _layer_specs(num_fields, channels, kernel_heights):
    layers = len(kernel_heights)
    chans = [1] + list(channels)
    specs = []
    H = num_fields
    for i in range(1, len(chans)):
        kh = kernel_heights[i - 1]
        if i < layers:
            k = max(3, int((1 - pow(float(i) / layers, layers - i)) * num_fields))
        else:
            k = 3
        Ho = H + kh - 1
        assert k <= Ho, f"KMaxPooling k={k} exceeds pooled height {Ho} (layer {i})"
        specs.append((chans[i - 1], chans[i], kh, k))
        H = k
    return specs


def _plan_lanes(be, target=2048):
    """Pad the packed batch*emb lane axis to an aligned size and pick the lane-block L.

    Guarantees: padded size and L are multiples of 128, L divides the padded size, and
    the grid has >= 2 steps whenever the padded size allows it (v7x: one block per core)."""
    q = 512 if be >= 512 else 128                 # lane quantum (always a 128 multiple)
    be_pad = -(-be // q) * q
    n_steps = max(1, -(-be_pad // target))
    if n_steps == 1 and be_pad >= 2 * q:
        n_steps = 2
    L = -(-be_pad // (n_steps * q)) * q
    return n_steps * L, L


def ccpm_conv_layer_forward(x, params, num_fields, channels, kernel_heights,
                            lane_block_target=2048):
    """Replicates CCPM_ConvLayer.forward (activation='Tanh') with one fused Pallas kernel."""
    B, Ci0, F, E = x.shape
    assert Ci0 == 1, "CCPM_ConvLayer expects input of shape (B, 1, num_fields, emb_dim)"
    assert F == num_fields

    specs = _layer_specs(num_fields, channels, kernel_heights)
    n_layers = len(specs)
    co_last, k_last = specs[-1][1], specs[-1][3]

    # Per-layer input-channel bands inside the padded-activation scratch.
    band_sizes = [s[0] for s in specs]
    band_offs = tuple(int(sum(band_sizes[:i])) for i in range(n_layers))
    c_total = int(sum(band_sizes))
    hp_max, h = 0, F
    for (_, _, kh, k) in specs:
        hp_max = max(hp_max, h + 2 * (kh - 1))
        h = k

    # ---- lane packing: (B, 1, F, E) -> (1, F, B*E), padded to an aligned lane count ----
    BE = B * E
    xp = jnp.transpose(x, (1, 2, 0, 3)).reshape(Ci0, F, BE)
    BE_pad, L = _plan_lanes(BE, lane_block_target)
    if BE_pad != BE:
        xp = jnp.pad(xp, ((0, 0), (0, 0), (0, BE_pad - BE)))
    grid = (BE_pad // L,)

    # In-kernel lane sub-chunk width (bounds vreg live state independently of L).
    sub = 256 if L % 256 == 0 else 128
    n_sub = L // sub

    flat_inputs = [xp]
    in_specs = [pl.BlockSpec((Ci0, F, L), lambda i: (0, 0, i))]
    for (w, b) in params:
        flat_inputs.append(w.reshape(-1).astype(jnp.float32))
        flat_inputs.append(b.astype(jnp.float32))
        in_specs.append(pl.BlockSpec(memory_space=pltpu.MemorySpace.SMEM))
        in_specs.append(pl.BlockSpec(memory_space=pltpu.MemorySpace.SMEM))

    kernel = functools.partial(_ccpm_fused_kernel, layer_specs=tuple(specs),
                               band_offs=band_offs, sub=sub, n_sub=n_sub)

    out_packed = pl.pallas_call(
        kernel,
        out_shape=jax.ShapeDtypeStruct((co_last * k_last, BE_pad), x.dtype),
        grid_spec=pltpu.PrefetchScalarGridSpec(
            num_scalar_prefetch=0,
            grid=grid,
            in_specs=in_specs,
            out_specs=pl.BlockSpec((co_last * k_last, L), lambda i: (0, i)),
            scratch_shapes=[pltpu.VMEM((c_total, hp_max, L), jnp.float32)],
        ),
        compiler_params=pltpu.CompilerParams(
            dimension_semantics=("parallel",),     # independent lane blocks -> v7x megacore
        ),
    )(*flat_inputs)

    # ---- unpack lanes: (Co*k, BE_pad) -> (B, Co, k, E), dropping the padded lanes ----
    out = out_packed[:, :BE].reshape(co_last, k_last, B, E)
    return jnp.transpose(out, (2, 0, 1, 3))


def _ref_forward(x, params, num_fields, channels, kernel_heights):
    """Pure-JAX reference (for sanity-checking the kernel)."""
    layers = len(kernel_heights)
    out = x
    for i in range(1, layers + 1):
        kh = kernel_heights[i - 1]
        if i < layers:
            k = max(3, int((1 - pow(float(i) / layers, layers - i)) * num_fields))
        else:
            k = 3
        w, b = params[i - 1]
        xp = jnp.pad(out, ((0, 0), (0, 0), (kh - 1, kh - 1), (0, 0)))
        conv = lax.conv_general_dilated(
            xp, w, window_strides=(1, 1), padding="VALID",
            dimension_numbers=("NCHW", "OIHW", "NCHW"),
        ) + b[None, :, None, None]
        y = jnp.moveaxis(conv, 2, -1)                 # (B, Co, E, Ho)
        _, idx = lax.top_k(y, k)
        idx = jnp.sort(idx, axis=-1)
        g = jnp.take_along_axis(y, idx, axis=-1)
        out = jnp.tanh(jnp.moveaxis(g, -1, 2))        # (B, Co, k, E)
    return out


def init_params(key, channels, kernel_heights):
    """Deterministic synthetic Conv2d weights (shapes match nn.Conv2d(Ci, Co, (kh, 1)))."""
    chans = [1] + list(channels)
    params = []
    for i in range(1, len(chans)):
        ci, co, kh = chans[i - 1], chans[i], kernel_heights[i - 1]
        key, kw, kb = jax.random.split(key, 3)
        fan_in = ci * kh
        bound = 1.0 / jnp.sqrt(fan_in)
        w = jax.random.uniform(kw, (co, ci, kh, 1), jnp.float32, -bound, bound)
        b = jax.random.uniform(kb, (co,), jnp.float32, -bound, bound)
        params.append((w, b))
    return params


if __name__ == "__main__":
    num_fields = 8
    key = jax.random.PRNGKey(0)

    # (channels, kernel_heights, batch, embedding_dim)
    configs = [
        ([3], [3], 6, 40),          # module defaults; BE=240 -> lane padding + 2 grid steps
        ([4, 3], [3, 2], 6, 40),    # two fused layers, same small shapes
        ([4, 3], [3, 2], 16, 48),   # BE=768 -> 2 steps of 512 lanes, in-kernel sub-chunking
    ]
    for channels, kernel_heights, batch, emb in configs:
        key, kx, kp = jax.random.split(key, 3)
        x = jax.random.normal(kx, (batch, 1, num_fields, emb), jnp.float32)
        params = init_params(kp, channels, kernel_heights)

        out = ccpm_conv_layer_forward(x, params, num_fields, channels, kernel_heights)
        out = jax.block_until_ready(out)

        ref = _ref_forward(x, params, num_fields, channels, kernel_heights)
        assert out.shape == ref.shape, (out.shape, ref.shape)
        assert jnp.allclose(out, ref, atol=1e-5, rtol=1e-5), \
            f"mismatch vs pure-JAX reference for {channels}, {kernel_heights}, B={batch}, E={emb}"

    print("KERNEL_OK")
</pallas_src>

<mosaic_0001>
module attributes {stable_mosaic.version = 11 : i64} {
  func.func @_ccpm_fused_kernel(%arg0: i32, %arg1: memref<1x8x128xf32, #tpu.memory_space<vmem>>, %arg2: memref<9xf32, #tpu.memory_space<smem>>, %arg3: memref<3xf32, #tpu.memory_space<smem>>, %arg4: memref<9x128xf32, #tpu.memory_space<vmem>>, %arg5: memref<1x12x128xf32, #tpu.memory_space<vmem>>) attributes {dimension_semantics = [#tpu.dimension_semantics<parallel>], iteration_bounds = array<i64: 2>, scalar_prefetch = 0 : i64, scratch_operands = 1 : i64, tpu.core_type = #tpu.core_type<tc>, window_params = [{transform_indices = @transform_0, window_bounds = array<i64: 1, 8, 128>}, {transform_indices = @transform_1, window_bounds = array<i64: 9>}, {transform_indices = @transform_2, window_bounds = array<i64: 3>}, {transform_indices = @transform_3, window_bounds = array<i64: 9, 128>}]} {
    %c0_i32 = arith.constant 0 : i32
    %c128_i32 = arith.constant 128 : i32
    %0 = arith.muli %c0_i32, %c128_i32 : i32
    %1 = tpu.assume_multiple %0, 128 : i32
    %cst = arith.constant 0.000000e+00 : f32
    %2 = vector.broadcast %cst : f32 to vector<2x128xf32>
    %c0 = arith.constant 0 : index
    %c0_0 = arith.constant 0 : index
    %3 = arith.index_cast %1 : i32 to index
    %4 = vector.load %arg5[%c0, %c0_0, %3] : memref<1x12x128xf32, #tpu.memory_space<vmem>>, vector<1x2x128xf32>
    %5 = vector.shape_cast %4 : vector<1x2x128xf32> to vector<2x128xf32>
    %6 = vector.shape_cast %2 : vector<2x128xf32> to vector<1x2x128xf32>
    tpu.vector_store %arg5[%c0, %c0_0, %3], %6 {strides = array<i32>} : memref<1x12x128xf32, #tpu.memory_space<vmem>>, vector<1x2x128xf32>,
    %c0_1 = arith.constant 0 : index
    %c10 = arith.constant 10 : index
    %7 = arith.index_cast %1 : i32 to index
    %8 = vector.load %arg5[%c0_1, %c10, %7] : memref<1x12x128xf32, #tpu.memory_space<vmem>>, vector<1x2x128xf32>
    %9 = vector.shape_cast %8 : vector<1x2x128xf32> to vector<2x128xf32>
    %10 = vector.shape_cast %2 : vector<2x128xf32> to vector<1x2x128xf32>
    tpu.vector_store %arg5[%c0_1, %c10, %7], %10 {strides = array<i32>} : memref<1x12x128xf32, #tpu.memory_space<vmem>>, vector<1x2x128xf32>,
    %c0_2 = arith.constant 0 : index
    %c0_3 = arith.constant 0 : index
    %11 = arith.index_cast %1 : i32 to index
    %12 = vector.load %arg1[%c0_2, %c0_3, %11] : memref<1x8x128xf32, #tpu.memory_space<vmem>>, vector<1x8x128xf32>
    %13 = vector.shape_cast %12 : vector<1x8x128xf32> to vector<8x128xf32>
    %c0_4 = arith.constant 0 : index
    %c2 = arith.constant 2 : index
    %14 = arith.index_cast %1 : i32 to index
    %15 = vector.load %arg5[%c0_4, %c2, %14] : memref<1x12x128xf32, #tpu.memory_space<vmem>>, vector<1x8x128xf32>
    %16 = vector.shape_cast %15 : vector<1x8x128xf32> to vector<8x128xf32>
    %17 = vector.shape_cast %13 : vector<8x128xf32> to vector<1x8x128xf32>
    tpu.vector_store %arg5[%c0_4, %c2, %14], %17 {strides = array<i32>} : memref<1x12x128xf32, #tpu.memory_space<vmem>>, vector<1x8x128xf32>,
    %c0_5 = arith.constant 0 : index
    %18 = memref.load %arg3[%c0_5] : memref<3xf32, #tpu.memory_space<smem>>
    %19 = vector.broadcast %18 : f32 to vector<10x128xf32>
    %c0_6 = arith.constant 0 : index
    %20 = memref.load %arg2[%c0_6] : memref<9xf32, #tpu.memory_space<smem>>
    %c0_7 = arith.constant 0 : index
    %c0_8 = arith.constant 0 : index
    %21 = arith.index_cast %1 : i32 to index
    %22 = vector.load %arg5[%c0_7, %c0_8, %21] : memref<1x12x128xf32, #tpu.memory_space<vmem>>, vector<1x10x128xf32>
    %23 = vector.shape_cast %22 : vector<1x10x128xf32> to vector<10x128xf32>
    %24 = vector.broadcast %20 : f32 to vector<10x128xf32>
    %25 = arith.mulf %24, %23 : vector<10x128xf32>
    %26 = arith.addf %19, %25 : vector<10x128xf32>
    %c1 = arith.constant 1 : index
    %27 = memref.load %arg2[%c1] : memref<9xf32, #tpu.memory_space<smem>>
    %c0_9 = arith.constant 0 : index
    %c1_10 = arith.constant 1 : index
    %28 = arith.index_cast %1 : i32 to index
    %29 = vector.load %arg5[%c0_9, %c1_10, %28] : memref<1x12x128xf32, #tpu.memory_space<vmem>>, vector<1x10x128xf32>
    %30 = vector.shape_cast %29 : vector<1x10x128xf32> to vector<10x128xf32>
    %31 = vector.broadcast %27 : f32 to vector<10x128xf32>
    %32 = arith.mulf %31, %30 : vector<10x128xf32>
    %33 = arith.addf %26, %32 : vector<10x128xf32>
    %c2_11 = arith.constant 2 : index
    %34 = memref.load %arg2[%c2_11] : memref<9xf32, #tpu.memory_space<smem>>
    %c0_12 = arith.constant 0 : index
    %c2_13 = arith.constant 2 : index
    %35 = arith.index_cast %1 : i32 to index
    %36 = vector.load %arg5[%c0_12, %c2_13, %35] : memref<1x12x128xf32, #tpu.memory_space<vmem>>, vector<1x10x128xf32>
    %37 = vector.shape_cast %36 : vector<1x10x128xf32> to vector<10x128xf32>
    %38 = vector.broadcast %34 : f32 to vector<10x128xf32>
    %39 = arith.mulf %38, %37 : vector<10x128xf32>
    %40 = arith.addf %33, %39 : vector<10x128xf32>
    %41 = tpu.iota {dimensions = array<i32: 0>} : vector<10x128xi32>
    %42 = arith.sitofp %41 : vector<10x128xi32> to vector<10x128xf32>
    %cst_14 = arith.constant dense<0xFF800000> : vector<128xf32>
    %43 = vector.multi_reduction <maximumf>, %40, %cst_14 [0] : vector<10x128xf32> to vector<128xf32>
    %44 = vector.shape_cast %43 : vector<128xf32> to vector<1x128xf32>
    %45 = vector.broadcast %44 : vector<1x128xf32> to vector<10x128xf32>
    %46 = arith.cmpf oeq, %40, %45 : vector<10x128xf32>
    %cst_15 = arith.constant 1.000000e+01 : f32
    %47 = vector.broadcast %cst_15 : f32 to vector<10x128xf32>
    %48 = arith.select %46, %42, %47 : vector<10x128xi1>, vector<10x128xf32>
    %cst_16 = arith.constant dense<0x7F800000> : vector<128xf32>
    %49 = vector.multi_reduction <minimumf>, %48, %cst_16 [0] : vector<10x128xf32> to vector<128xf32>
    %50 = vector.shape_cast %49 : vector<128xf32> to vector<1x128xf32>
    %51 = vector.broadcast %50 : vector<1x128xf32> to vector<10x128xf32>
    %52 = arith.cmpf oeq, %42, %51 : vector<10x128xf32>
    %cst_17 = arith.constant 0xFF800000 : f32
    %53 = vector.broadcast %cst_17 : f32 to vector<10x128xf32>
    %54 = arith.select %52, %53, %40 : vector<10x128xi1>, vector<10x128xf32>
    %cst_18 = arith.constant dense<0xFF800000> : vector<128xf32>
    %55 = vector.multi_reduction <maximumf>, %54, %cst_18 [0] : vector<10x128xf32> to vector<128xf32>
    %56 = vector.shape_cast %55 : vector<128xf32> to vector<1x128xf32>
    %57 = vector.broadcast %56 : vector<1x128xf32> to vector<10x128xf32>
    %58 = arith.cmpf oeq, %54, %57 : vector<10x128xf32>
    %cst_19 = arith.constant 1.000000e+01 : f32
    %59 = vector.broadcast %cst_19 : f32 to vector<10x128xf32>
    %60 = arith.select %58, %42, %59 : vector<10x128xi1>, vector<10x128xf32>
    %cst_20 = arith.constant dense<0x7F800000> : vector<128xf32>
    %61 = vector.multi_reduction <minimumf>, %60, %cst_20 [0] : vector<10x128xf32> to vector<128xf32>
    %62 = vector.shape_cast %61 : vector<128xf32> to vector<1x128xf32>
    %63 = vector.broadcast %62 : vector<1x128xf32> to vector<10x128xf32>
    %64 = arith.cmpf oeq, %42, %63 : vector<10x128xf32>
    %cst_21 = arith.constant 0xFF800000 : f32
    %65 = vector.broadcast %cst_21 : f32 to vector<10x128xf32>
    %66 = arith.select %64, %65, %54 : vector<10x128xi1>, vector<10x128xf32>
    %cst_22 = arith.constant dense<0xFF800000> : vector<128xf32>
    %67 = vector.multi_reduction <maximumf>, %66, %cst_22 [0] : vector<10x128xf32> to vector<128xf32>
    %68 = vector.shape_cast %67 : vector<128xf32> to vector<1x128xf32>
    %69 = vector.broadcast %68 : vector<1x128xf32> to vector<10x128xf32>
    %70 = arith.cmpf oeq, %66, %69 : vector<10x128xf32>
    %cst_23 = arith.constant 1.000000e+01 : f32
    %71 = vector.broadcast %cst_23 : f32 to vector<10x128xf32>
    %72 = arith.select %70, %42, %71 : vector<10x128xi1>, vector<10x128xf32>
    %cst_24 = arith.constant dense<0x7F800000> : vector<128xf32>
    %73 = vector.multi_reduction <minimumf>, %72, %cst_24 [0] : vector<10x128xf32> to vector<128xf32>
    %74 = vector.shape_cast %73 : vector<128xf32> to vector<1x128xf32>
    %75 = tpu.iota {dimensions = array<i32: 0>} : vector<3x128xi32>
    %76 = arith.sitofp %75 : vector<3x128xi32> to vector<3x128xf32>
    %cst_25 = arith.constant 0.000000e+00 : f32
    %77 = vector.broadcast %cst_25 : f32 to vector<3x128xf32>
    %cst_26 = arith.constant 0.000000e+00 : f32
    %78 = vector.broadcast %cst_26 : f32 to vector<1x128xf32>
    %79 = arith.cmpf olt, %62, %50 : vector<1x128xf32>
    %80 = arith.extui %79 : vector<1x128xi1> to vector<1x128xi32>
    %81 = arith.sitofp %80 : vector<1x128xi32> to vector<1x128xf32>
    %82 = arith.addf %78, %81 : vector<1x128xf32>
    %83 = arith.cmpf olt, %74, %50 : vector<1x128xf32>
    %84 = arith.extui %83 : vector<1x128xi1> to vector<1x128xi32>
    %85 = arith.sitofp %84 : vector<1x128xi32> to vector<1x128xf32>
    %86 = arith.addf %82, %85 : vector<1x128xf32>
    %87 = vector.broadcast %86 : vector<1x128xf32> to vector<3x128xf32>
    %88 = arith.cmpf oeq, %76, %87 : vector<3x128xf32>
    %cst_27 = arith.constant 0.000000e+00 : f32
    %89 = vector.shape_cast %44 : vector<1x128xf32> to vector<1x128xf32>
    %90 = vector.broadcast %89 : vector<1x128xf32> to vector<3x128xf32>
    %91 = vector.broadcast %cst_27 : f32 to vector<3x128xf32>
    %92 = arith.select %88, %90, %91 : vector<3x128xi1>, vector<3x128xf32>
    %93 = arith.addf %77, %92 : vector<3x128xf32>
    %cst_28 = arith.constant 0.000000e+00 : f32
    %94 = vector.broadcast %cst_28 : f32 to vector<1x128xf32>
    %95 = arith.cmpf olt, %50, %62 : vector<1x128xf32>
    %96 = arith.extui %95 : vector<1x128xi1> to vector<1x128xi32>
    %97 = arith.sitofp %96 : vector<1x128xi32> to vector<1x128xf32>
    %98 = arith.addf %94, %97 : vector<1x128xf32>
    %99 = arith.cmpf olt, %74, %62 : vector<1x128xf32>
    %100 = arith.extui %99 : vector<1x128xi1> to vector<1x128xi32>
    %101 = arith.sitofp %100 : vector<1x128xi32> to vector<1x128xf32>
    %102 = arith.addf %98, %101 : vector<1x128xf32>
    %103 = vector.broadcast %102 : vector<1x128xf32> to vector<3x128xf32>
    %104 = arith.cmpf oeq, %76, %103 : vector<3x128xf32>
    %cst_29 = arith.constant 0.000000e+00 : f32
    %105 = vector.shape_cast %56 : vector<1x128xf32> to vector<1x128xf32>
    %106 = vector.broadcast %105 : vector<1x128xf32> to vector<3x128xf32>
    %107 = vector.broadcast %cst_29 : f32 to vector<3x128xf32>
    %108 = arith.select %104, %106, %107 : vector<3x128xi1>, vector<3x128xf32>
    %109 = arith.addf %93, %108 : vector<3x128xf32>
    %cst_30 = arith.constant 0.000000e+00 : f32
    %110 = vector.broadcast %cst_30 : f32 to vector<1x128xf32>
    %111 = arith.cmpf olt, %50, %74 : vector<1x128xf32>
    %112 = arith.extui %111 : vector<1x128xi1> to vector<1x128xi32>
    %113 = arith.sitofp %112 : vector<1x128xi32> to vector<1x128xf32>
    %114 = arith.addf %110, %113 : vector<1x128xf32>
    %115 = arith.cmpf olt, %62, %74 : vector<1x128xf32>
    %116 = arith.extui %115 : vector<1x128xi1> to vector<1x128xi32>
    %117 = arith.sitofp %116 : vector<1x128xi32> to vector<1x128xf32>
    %118 = arith.addf %114, %117 : vector<1x128xf32>
    %119 = vector.broadcast %118 : vector<1x128xf32> to vector<3x128xf32>
    %120 = arith.cmpf oeq, %76, %119 : vector<3x128xf32>
    %cst_31 = arith.constant 0.000000e+00 : f32
    %121 = vector.shape_cast %68 : vector<1x128xf32> to vector<1x128xf32>
    %122 = vector.broadcast %121 : vector<1x128xf32> to vector<3x128xf32>
    %123 = vector.broadcast %cst_31 : f32 to vector<3x128xf32>
    %124 = arith.select %120, %122, %123 : vector<3x128xi1>, vector<3x128xf32>
    %125 = arith.addf %109, %124 : vector<3x128xf32>
    %126 = math.tanh %125 : vector<3x128xf32>
    %c0_32 = arith.constant 0 : index
    %127 = arith.index_cast %1 : i32 to index
    %128 = vector.load %arg4[%c0_32, %127] : memref<9x128xf32, #tpu.memory_space<vmem>>, vector<3x128xf32>
    tpu.vector_store %arg4[%c0_32, %127], %126 {strides = array<i32>} : memref<9x128xf32, #tpu.memory_space<vmem>>, vector<3x128xf32>,
    %c1_33 = arith.constant 1 : index
    %129 = memref.load %arg3[%c1_33] : memref<3xf32, #tpu.memory_space<smem>>
    %130 = vector.broadcast %129 : f32 to vector<10x128xf32>
    %c3 = arith.constant 3 : index
    %131 = memref.load %arg2[%c3] : memref<9xf32, #tpu.memory_space<smem>>
    %c0_34 = arith.constant 0 : index
    %c0_35 = arith.constant 0 : index
    %132 = arith.index_cast %1 : i32 to index
    %133 = vector.load %arg5[%c0_34, %c0_35, %132] : memref<1x12x128xf32, #tpu.memory_space<vmem>>, vector<1x10x128xf32>
    %134 = vector.shape_cast %133 : vector<1x10x128xf32> to vector<10x128xf32>
    %135 = vector.broadcast %131 : f32 to vector<10x128xf32>
    %136 = arith.mulf %135, %134 : vector<10x128xf32>
    %137 = arith.addf %130, %136 : vector<10x128xf32>
    %c4 = arith.constant 4 : index
    %138 = memref.load %arg2[%c4] : memref<9xf32, #tpu.memory_space<smem>>
    %c0_36 = arith.constant 0 : index
    %c1_37 = arith.constant 1 : index
    %139 = arith.index_cast %1 : i32 to index
    %140 = vector.load %arg5[%c0_36, %c1_37, %139] : memref<1x12x128xf32, #tpu.memory_space<vmem>>, vector<1x10x128xf32>
    %141 = vector.shape_cast %140 : vector<1x10x128xf32> to vector<10x128xf32>
    %142 = vector.broadcast %138 : f32 to vector<10x128xf32>
    %143 = arith.mulf %142, %141 : vector<10x128xf32>
    %144 = arith.addf %137, %143 : vector<10x128xf32>
    %c5 = arith.constant 5 : index
    %145 = memref.load %arg2[%c5] : memref<9xf32, #tpu.memory_space<smem>>
    %c0_38 = arith.constant 0 : index
    %c2_39 = arith.constant 2 : index
    %146 = arith.index_cast %1 : i32 to index
    %147 = vector.load %arg5[%c0_38, %c2_39, %146] : memref<1x12x128xf32, #tpu.memory_space<vmem>>, vector<1x10x128xf32>
    %148 = vector.shape_cast %147 : vector<1x10x128xf32> to vector<10x128xf32>
    %149 = vector.broadcast %145 : f32 to vector<10x128xf32>
    %150 = arith.mulf %149, %148 : vector<10x128xf32>
    %151 = arith.addf %144, %150 : vector<10x128xf32>
    %152 = tpu.iota {dimensions = array<i32: 0>} : vector<10x128xi32>
    %153 = arith.sitofp %152 : vector<10x128xi32> to vector<10x128xf32>
    %cst_40 = arith.constant dense<0xFF800000> : vector<128xf32>
    %154 = vector.multi_reduction <maximumf>, %151, %cst_40 [0] : vector<10x128xf32> to vector<128xf32>
    %155 = vector.shape_cast %154 : vector<128xf32> to vector<1x128xf32>
    %156 = vector.broadcast %155 : vector<1x128xf32> to vector<10x128xf32>
    %157 = arith.cmpf oeq, %151, %156 : vector<10x128xf32>
    %cst_41 = arith.constant 1.000000e+01 : f32
    %158 = vector.broadcast %cst_41 : f32 to vector<10x128xf32>
    %159 = arith.select %157, %153, %158 : vector<10x128xi1>, vector<10x128xf32>
    %cst_42 = arith.constant dense<0x7F800000> : vector<128xf32>
    %160 = vector.multi_reduction <minimumf>, %159, %cst_42 [0] : vector<10x128xf32> to vector<128xf32>
    %161 = vector.shape_cast %160 : vector<128xf32> to vector<1x128xf32>
    %162 = vector.broadcast %161 : vector<1x128xf32> to vector<10x128xf32>
    %163 = arith.cmpf oeq, %153, %162 : vector<10x128xf32>
    %cst_43 = arith.constant 0xFF800000 : f32
    %164 = vector.broadcast %cst_43 : f32 to vector<10x128xf32>
    %165 = arith.select %163, %164, %151 : vector<10x128xi1>, vector<10x128xf32>
    %cst_44 = arith.constant dense<0xFF800000> : vector<128xf32>
    %166 = vector.multi_reduction <maximumf>, %165, %cst_44 [0] : vector<10x128xf32> to vector<128xf32>
    %167 = vector.shape_cast %166 : vector<128xf32> to vector<1x128xf32>
    %168 = vector.broadcast %167 : vector<1x128xf32> to vector<10x128xf32>
    %169 = arith.cmpf oeq, %165, %168 : vector<10x128xf32>
    %cst_45 = arith.constant 1.000000e+01 : f32
    %170 = vector.broadcast %cst_45 : f32 to vector<10x128xf32>
    %171 = arith.select %169, %153, %170 : vector<10x128xi1>, vector<10x128xf32>
    %cst_46 = arith.constant dense<0x7F800000> : vector<128xf32>
    %172 = vector.multi_reduction <minimumf>, %171, %cst_46 [0] : vector<10x128xf32> to vector<128xf32>
    %173 = vector.shape_cast %172 : vector<128xf32> to vector<1x128xf32>
    %174 = vector.broadcast %173 : vector<1x128xf32> to vector<10x128xf32>
    %175 = arith.cmpf oeq, %153, %174 : vector<10x128xf32>
    %cst_47 = arith.constant 0xFF800000 : f32
    %176 = vector.broadcast %cst_47 : f32 to vector<10x128xf32>
    %177 = arith.select %175, %176, %165 : vector<10x128xi1>, vector<10x128xf32>
    %cst_48 = arith.constant dense<0xFF800000> : vector<128xf32>
    %178 = vector.multi_reduction <maximumf>, %177, %cst_48 [0] : vector<10x128xf32> to vector<128xf32>
    %179 = vector.shape_cast %178 : vector<128xf32> to vector<1x128xf32>
    %180 = vector.broadcast %179 : vector<1x128xf32> to vector<10x128xf32>
    %181 = arith.cmpf oeq, %177, %180 : vector<10x128xf32>
    %cst_49 = arith.constant 1.000000e+01 : f32
    %182 = vector.broadcast %cst_49 : f32 to vector<10x128xf32>
    %183 = arith.select %181, %153, %182 : vector<10x128xi1>, vector<10x128xf32>
    %cst_50 = arith.constant dense<0x7F800000> : vector<128xf32>
    %184 = vector.multi_reduction <minimumf>, %183, %cst_50 [0] : vector<10x128xf32> to vector<128xf32>
    %185 = vector.shape_cast %184 : vector<128xf32> to vector<1x128xf32>
    %186 = tpu.iota {dimensions = array<i32: 0>} : vector<3x128xi32>
    %187 = arith.sitofp %186 : vector<3x128xi32> to vector<3x128xf32>
    %cst_51 = arith.constant 0.000000e+00 : f32
    %188 = vector.broadcast %cst_51 : f32 to vector<3x128xf32>
    %cst_52 = arith.constant 0.000000e+00 : f32
    %189 = vector.broadcast %cst_52 : f32 to vector<1x128xf32>
    %190 = arith.cmpf olt, %173, %161 : vector<1x128xf32>
    %191 = arith.extui %190 : vector<1x128xi1> to vector<1x128xi32>
    %192 = arith.sitofp %191 : vector<1x128xi32> to vector<1x128xf32>
    %193 = arith.addf %189, %192 : vector<1x128xf32>
    %194 = arith.cmpf olt, %185, %161 : vector<1x128xf32>
    %195 = arith.extui %194 : vector<1x128xi1> to vector<1x128xi32>
    %196 = arith.sitofp %195 : vector<1x128xi32> to vector<1x128xf32>
    %197 = arith.addf %193, %196 : vector<1x128xf32>
    %198 = vector.broadcast %197 : vector<1x128xf32> to vector<3x128xf32>
    %199 = arith.cmpf oeq, %187, %198 : vector<3x128xf32>
    %cst_53 = arith.constant 0.000000e+00 : f32
    %200 = vector.shape_cast %155 : vector<1x128xf32> to vector<1x128xf32>
    %201 = vector.broadcast %200 : vector<1x128xf32> to vector<3x128xf32>
    %202 = vector.broadcast %cst_53 : f32 to vector<3x128xf32>
    %203 = arith.select %199, %201, %202 : vector<3x128xi1>, vector<3x128xf32>
    %204 = arith.addf %188, %203 : vector<3x128xf32>
    %cst_54 = arith.constant 0.000000e+00 : f32
    %205 = vector.broadcast %cst_54 : f32 to vector<1x128xf32>
    %206 = arith.cmpf olt, %161, %173 : vector<1x128xf32>
    %207 = arith.extui %206 : vector<1x128xi1> to vector<1x128xi32>
    %208 = arith.sitofp %207 : vector<1x128xi32> to vector<1x128xf32>
    %209 = arith.addf %205, %208 : vector<1x128xf32>
    %210 = arith.cmpf olt, %185, %173 : vector<1x128xf32>
    %211 = arith.extui %210 : vector<1x128xi1> to vector<1x128xi32>
    %212 = arith.sitofp %211 : vector<1x128xi32> to vector<1x128xf32>
    %213 = arith.addf %209, %212 : vector<1x128xf32>
    %214 = vector.broadcast %213 : vector<1x128xf32> to vector<3x128xf32>
    %215 = arith.cmpf oeq, %187, %214 : vector<3x128xf32>
    %cst_55 = arith.constant 0.000000e+00 : f32
    %216 = vector.shape_cast %167 : vector<1x128xf32> to vector<1x128xf32>
    %217 = vector.broadcast %216 : vector<1x128xf32> to vector<3x128xf32>
    %218 = vector.broadcast %cst_55 : f32 to vector<3x128xf32>
    %219 = arith.select %215, %217, %218 : vector<3x128xi1>, vector<3x128xf32>
    %220 = arith.addf %204, %219 : vector<3x128xf32>
    %cst_56 = arith.constant 0.000000e+00 : f32
    %221 = vector.broadcast %cst_56 : f32 to vector<1x128xf32>
    %222 = arith.cmpf olt, %161, %185 : vector<1x128xf32>
    %223 = arith.extui %222 : vector<1x128xi1> to vector<1x128xi32>
    %224 = arith.sitofp %223 : vector<1x128xi32> to vector<1x128xf32>
    %225 = arith.addf %221, %224 : vector<1x128xf32>
    %226 = arith.cmpf olt, %173, %185 : vector<1x128xf32>
    %227 = arith.extui %226 : vector<1x128xi1> to vector<1x128xi32>
    %228 = arith.sitofp %227 : vector<1x128xi32> to vector<1x128xf32>
    %229 = arith.addf %225, %228 : vector<1x128xf32>
    %230 = vector.broadcast %229 : vector<1x128xf32> to vector<3x128xf32>
    %231 = arith.cmpf oeq, %187, %230 : vector<3x128xf32>
    %cst_57 = arith.constant 0.000000e+00 : f32
    %232 = vector.shape_cast %179 : vector<1x128xf32> to vector<1x128xf32>
    %233 = vector.broadcast %232 : vector<1x128xf32> to vector<3x128xf32>
    %234 = vector.broadcast %cst_57 : f32 to vector<3x128xf32>
    %235 = arith.select %231, %233, %234 : vector<3x128xi1>, vector<3x128xf32>
    %236 = arith.addf %220, %235 : vector<3x128xf32>
    %237 = math.tanh %236 : vector<3x128xf32>
    %c3_58 = arith.constant 3 : index
    %238 = arith.index_cast %1 : i32 to index
    %239 = vector.load %arg4[%c3_58, %238] : memref<9x128xf32, #tpu.memory_space<vmem>>, vector<3x128xf32>
    tpu.vector_store %arg4[%c3_58, %238], %237 {strides = array<i32>} : memref<9x128xf32, #tpu.memory_space<vmem>>, vector<3x128xf32>,
    %c2_59 = arith.constant 2 : index
    %240 = memref.load %arg3[%c2_59] : memref<3xf32, #tpu.memory_space<smem>>
    %241 = vector.broadcast %240 : f32 to vector<10x128xf32>
    %c6 = arith.constant 6 : index
    %242 = memref.load %arg2[%c6] : memref<9xf32, #tpu.memory_space<smem>>
    %c0_60 = arith.constant 0 : index
    %c0_61 = arith.constant 0 : index
    %243 = arith.index_cast %1 : i32 to index
    %244 = vector.load %arg5[%c0_60, %c0_61, %243] : memref<1x12x128xf32, #tpu.memory_space<vmem>>, vector<1x10x128xf32>
    %245 = vector.shape_cast %244 : vector<1x10x128xf32> to vector<10x128xf32>
    %246 = vector.broadcast %242 : f32 to vector<10x128xf32>
    %247 = arith.mulf %246, %245 : vector<10x128xf32>
    %248 = arith.addf %241, %247 : vector<10x128xf32>
    %c7 = arith.constant 7 : index
    %249 = memref.load %arg2[%c7] : memref<9xf32, #tpu.memory_space<smem>>
    %c0_62 = arith.constant 0 : index
    %c1_63 = arith.constant 1 : index
    %250 = arith.index_cast %1 : i32 to index
    %251 = vector.load %arg5[%c0_62, %c1_63, %250] : memref<1x12x128xf32, #tpu.memory_space<vmem>>, vector<1x10x128xf32>
    %252 = vector.shape_cast %251 : vector<1x10x128xf32> to vector<10x128xf32>
    %253 = vector.broadcast %249 : f32 to vector<10x128xf32>
    %254 = arith.mulf %253, %252 : vector<10x128xf32>
    %255 = arith.addf %248, %254 : vector<10x128xf32>
    %c8 = arith.constant 8 : index
    %256 = memref.load %arg2[%c8] : memref<9xf32, #tpu.memory_space<smem>>
    %c0_64 = arith.constant 0 : index
    %c2_65 = arith.constant 2 : index
    %257 = arith.index_cast %1 : i32 to index
    %258 = vector.load %arg5[%c0_64, %c2_65, %257] : memref<1x12x128xf32, #tpu.memory_space<vmem>>, vector<1x10x128xf32>
    %259 = vector.shape_cast %258 : vector<1x10x128xf32> to vector<10x128xf32>
    %260 = vector.broadcast %256 : f32 to vector<10x128xf32>
    %261 = arith.mulf %260, %259 : vector<10x128xf32>
    %262 = arith.addf %255, %261 : vector<10x128xf32>
    %263 = tpu.iota {dimensions = array<i32: 0>} : vector<10x128xi32>
    %264 = arith.sitofp %263 : vector<10x128xi32> to vector<10x128xf32>
    %cst_66 = arith.constant dense<0xFF800000> : vector<128xf32>
    %265 = vector.multi_reduction <maximumf>, %262, %cst_66 [0] : vector<10x128xf32> to vector<128xf32>
    %266 = vector.shape_cast %265 : vector<128xf32> to vector<1x128xf32>
    %267 = vector.broadcast %266 : vector<1x128xf32> to vector<10x128xf32>
    %268 = arith.cmpf oeq, %262, %267 : vector<10x128xf32>
    %cst_67 = arith.constant 1.000000e+01 : f32
    %269 = vector.broadcast %cst_67 : f32 to vector<10x128xf32>
    %270 = arith.select %268, %264, %269 : vector<10x128xi1>, vector<10x128xf32>
    %cst_68 = arith.constant dense<0x7F800000> : vector<128xf32>
    %271 = vector.multi_reduction <minimumf>, %270, %cst_68 [0] : vector<10x128xf32> to vector<128xf32>
    %272 = vector.shape_cast %271 : vector<128xf32> to vector<1x128xf32>
    %273 = vector.broadcast %272 : vector<1x128xf32> to vector<10x128xf32>
    %274 = arith.cmpf oeq, %264, %273 : vector<10x128xf32>
    %cst_69 = arith.constant 0xFF800000 : f32
    %275 = vector.broadcast %cst_69 : f32 to vector<10x128xf32>
    %276 = arith.select %274, %275, %262 : vector<10x128xi1>, vector<10x128xf32>
    %cst_70 = arith.constant dense<0xFF800000> : vector<128xf32>
    %277 = vector.multi_reduction <maximumf>, %276, %cst_70 [0] : vector<10x128xf32> to vector<128xf32>
    %278 = vector.shape_cast %277 : vector<128xf32> to vector<1x128xf32>
    %279 = vector.broadcast %278 : vector<1x128xf32> to vector<10x128xf32>
    %280 = arith.cmpf oeq, %276, %279 : vector<10x128xf32>
    %cst_71 = arith.constant 1.000000e+01 : f32
    %281 = vector.broadcast %cst_71 : f32 to vector<10x128xf32>
    %282 = arith.select %280, %264, %281 : vector<10x128xi1>, vector<10x128xf32>
    %cst_72 = arith.constant dense<0x7F800000> : vector<128xf32>
    %283 = vector.multi_reduction <minimumf>, %282, %cst_72 [0] : vector<10x128xf32> to vector<128xf32>
    %284 = vector.shape_cast %283 : vector<128xf32> to vector<1x128xf32>
    %285 = vector.broadcast %284 : vector<1x128xf32> to vector<10x128xf32>
    %286 = arith.cmpf oeq, %264, %285 : vector<10x128xf32>
    %cst_73 = arith.constant 0xFF800000 : f32
    %287 = vector.broadcast %cst_73 : f32 to vector<10x128xf32>
    %288 = arith.select %286, %287, %276 : vector<10x128xi1>, vector<10x128xf32>
    %cst_74 = arith.constant dense<0xFF800000> : vector<128xf32>
    %289 = vector.multi_reduction <maximumf>, %288, %cst_74 [0] : vector<10x128xf32> to vector<128xf32>
    %290 = vector.shape_cast %289 : vector<128xf32> to vector<1x128xf32>
    %291 = vector.broadcast %290 : vector<1x128xf32> to vector<10x128xf32>
    %292 = arith.cmpf oeq, %288, %291 : vector<10x128xf32>
    %cst_75 = arith.constant 1.000000e+01 : f32
    %293 = vector.broadcast %cst_75 : f32 to vector<10x128xf32>
    %294 = arith.select %292, %264, %293 : vector<10x128xi1>, vector<10x128xf32>
    %cst_76 = arith.constant dense<0x7F800000> : vector<128xf32>
    %295 = vector.multi_reduction <minimumf>, %294, %cst_76 [0] : vector<10x128xf32> to vector<128xf32>
    %296 = vector.shape_cast %295 : vector<128xf32> to vector<1x128xf32>
    %297 = tpu.iota {dimensions = array<i32: 0>} : vector<3x128xi32>
    %298 = arith.sitofp %297 : vector<3x128xi32> to vector<3x128xf32>
    %cst_77 = arith.constant 0.000000e+00 : f32
    %299 = vector.broadcast %cst_77 : f32 to vector<3x128xf32>
    %cst_78 = arith.constant 0.000000e+00 : f32
    %300 = vector.broadcast %cst_78 : f32 to vector<1x128xf32>
    %301 = arith.cmpf olt, %284, %272 : vector<1x128xf32>
    %302 = arith.extui %301 : vector<1x128xi1> to vector<1x128xi32>
    %303 = arith.sitofp %302 : vector<1x128xi32> to vector<1x128xf32>
    %304 = arith.addf %300, %303 : vector<1x128xf32>
    %305 = arith.cmpf olt, %296, %272 : vector<1x128xf32>
    %306 = arith.extui %305 : vector<1x128xi1> to vector<1x128xi32>
    %307 = arith.sitofp %306 : vector<1x128xi32> to vector<1x128xf32>
    %308 = arith.addf %304, %307 : vector<1x128xf32>
    %309 = vector.broadcast %308 : vector<1x128xf32> to vector<3x128xf32>
    %310 = arith.cmpf oeq, %298, %309 : vector<3x128xf32>
    %cst_79 = arith.constant 0.000000e+00 : f32
    %311 = vector.shape_cast %266 : vector<1x128xf32> to vector<1x128xf32>
    %312 = vector.broadcast %311 : vector<1x128xf32> to vector<3x128xf32>
    %313 = vector.broadcast %cst_79 : f32 to vector<3x128xf32>
    %314 = arith.select %310, %312, %313 : vector<3x128xi1>, vector<3x128xf32>
    %315 = arith.addf %299, %314 : vector<3x128xf32>
    %cst_80 = arith.constant 0.000000e+00 : f32
    %316 = vector.broadcast %cst_80 : f32 to vector<1x128xf32>
    %317 = arith.cmpf olt, %272, %284 : vector<1x128xf32>
    %318 = arith.extui %317 : vector<1x128xi1> to vector<1x128xi32>
    %319 = arith.sitofp %318 : vector<1x128xi32> to vector<1x128xf32>
    %320 = arith.addf %316, %319 : vector<1x128xf32>
    %321 = arith.cmpf olt, %296, %284 : vector<1x128xf32>
    %322 = arith.extui %321 : vector<1x128xi1> to vector<1x128xi32>
    %323 = arith.sitofp %322 : vector<1x128xi32> to vector<1x128xf32>
    %324 = arith.addf %320, %323 : vector<1x128xf32>
    %325 = vector.broadcast %324 : vector<1x128xf32> to vector<3x128xf32>
    %326 = arith.cmpf oeq, %298, %325 : vector<3x128xf32>
    %cst_81 = arith.constant 0.000000e+00 : f32
    %327 = vector.shape_cast %278 : vector<1x128xf32> to vector<1x128xf32>
    %328 = vector.broadcast %327 : vector<1x128xf32> to vector<3x128xf32>
    %329 = vector.broadcast %cst_81 : f32 to vector<3x128xf32>
    %330 = arith.select %326, %328, %329 : vector<3x128xi1>, vector<3x128xf32>
    %331 = arith.addf %315, %330 : vector<3x128xf32>
    %cst_82 = arith.constant 0.000000e+00 : f32
    %332 = vector.broadcast %cst_82 : f32 to vector<1x128xf32>
    %333 = arith.cmpf olt, %272, %296 : vector<1x128xf32>
    %334 = arith.extui %333 : vector<1x128xi1> to vector<1x128xi32>
    %335 = arith.sitofp %334 : vector<1x128xi32> to vector<1x128xf32>
    %336 = arith.addf %332, %335 : vector<1x128xf32>
    %337 = arith.cmpf olt, %284, %296 : vector<1x128xf32>
    %338 = arith.extui %337 : vector<1x128xi1> to vector<1x128xi32>
    %339 = arith.sitofp %338 : vector<1x128xi32> to vector<1x128xf32>
    %340 = arith.addf %336, %339 : vector<1x128xf32>
    %341 = vector.broadcast %340 : vector<1x128xf32> to vector<3x128xf32>
    %342 = arith.cmpf oeq, %298, %341 : vector<3x128xf32>
    %cst_83 = arith.constant 0.000000e+00 : f32
    %343 = vector.shape_cast %290 : vector<1x128xf32> to vector<1x128xf32>
    %344 = vector.broadcast %343 : vector<1x128xf32> to vector<3x128xf32>
    %345 = vector.broadcast %cst_83 : f32 to vector<3x128xf32>
    %346 = arith.select %342, %344, %345 : vector<3x128xi1>, vector<3x128xf32>
    %347 = arith.addf %331, %346 : vector<3x128xf32>
    %348 = math.tanh %347 : vector<3x128xf32>
    %c6_84 = arith.constant 6 : index
    %349 = arith.index_cast %1 : i32 to index
    %350 = vector.load %arg4[%c6_84, %349] : memref<9x128xf32, #tpu.memory_space<vmem>>, vector<3x128xf32>
    tpu.vector_store %arg4[%c6_84, %349], %348 {strides = array<i32>} : memref<9x128xf32, #tpu.memory_space<vmem>>, vector<3x128xf32>,
    %c1_i32 = arith.constant 1 : i32
    return
  }
  func.func @transform_0(%arg0: i32) -> (i32, i32, i32) {
    %c0_i32 = arith.constant 0 : i32
    %c0_i32_0 = arith.constant 0 : i32
    %c0_i32_1 = arith.constant 0 : i32
    return %c0_i32, %c0_i32_0, %arg0 : i32, i32, i32
  }
  func.func @transform_1(%arg0: i32) -> i32 {
    %c0_i32 = arith.constant 0 : i32
    %c0_i32_0 = arith.constant 0 : i32
    return %c0_i32 : i32
  }
  func.func @transform_2(%arg0: i32) -> i32 {
    %c0_i32 = arith.constant 0 : i32
    %c0_i32_0 = arith.constant 0 : i32
    return %c0_i32 : i32
  }
  func.func @transform_3(%arg0: i32) -> (i32, i32) {
    %c0_i32 = arith.constant 0 : i32
    %c0_i32_0 = arith.constant 0 : i32
    return %c0_i32, %arg0 : i32, i32
  }
}

</mosaic_0001>

<bundles_post_ra>
// kernel: tpu_custom_call.1
= control target key start
LH: loop header
LB: loop body
LE: loop exit
PB: predicated region body
PF: predicated region fallthrough
CT: control target
= control target key end

     0   :  { %8 = vsyncpa [#allocation4], 0  ;;  %s1465_s0 = inlined_call_operand.hbm [shape: f32[1,8,256], index: 0, kind: input, shape index: {}]   ;;  %s1466_s1 = inlined_call_operand.vmem [shape: f32[9], index: 1, kind: input, shape index: {}]   ;;  %s1467_s2 = inlined_call_operand.vmem [shape: f32[3], index: 2, kind: input, shape index: {}]   ;;  %s1468_s3 = inlined_call_operand.hbm [shape: f32[9,256], index: 3, kind: output, shape index: {}]  }
   0x1   :  { %10 = vsyncpa [#allocation4 + $0x1], 0 }
   0x2   :  { %11 = vsyncpa [#allocation6], 0 }
   0x3   :  { %12 = vsyncpa [#allocation9], 0 }
   0x4   :  { %13 = vsyncpa [#allocation5], 0 }
   0x5   :  { %15 = vsyncpa [#allocation5 + $0x1], 0  ;;  %s1003_s12 = smov 0   ;;  %s1005_s13 = smov 0  }
   0x6   :  { %s1007_s14 = smov 0   ;;  %s1009_s15 = smov 0  }
   0x7 LB: > { %s1024_s16 = sadd.s32 4294967295, %s973_s15   ;;  %s718_s17 = sadd.s32 4294967294, %s973_s15   ;;  %s973_s15 = sphi %s1009_s15, %s1490_s15   ;;  %s969_s14 = sphi %s1007_s14, %s1489_s14   ;;  %s965_s13 = sphi %s1005_s13, %s1488_s13   ;;  %s961_s12 = sphi %s1003_s12, %s1487_s12  }
   0x8   : > { %p41_p0 = scmp.ne.s32.totalorder %s965_s13, %s961_s12  ;;  %p1469_p1 = scmp.eq.s32.totalorder %s1024_s16, 0 }
   0x9   : > { %p113_p3 = scmp.eq.s32.totalorder %s718_s17, 1  ;;  %p719_p5 = scmp.ge.s32.totalorder %s973_s15, 1 }
   0xa   : > { %p1033_p4 = por %p1469_p1, %p41_p0  ;;  %p120_p7 = scmp.lt.s32.totalorder %s973_s15, 3 }
   0xb   : > { %p1038_p6 = por %p113_p3, %p41_p0  ;;  %s133_s22 = sshll.u32 %s1466_s1, 4  ;;  %s134_s22 = int_to_ptr.vmem [resolvable:$true] %s133_s22 }
   0xc   : > { %s1472_s18 = scalar_select %p1033_p4, 1, 0 }
   0xd   : > { %s1473_s19 = scalar_select %p1038_p6, 1, 0 }
   0xe   : > { %p1046_p8 = pnand %p719_p5, %p120_p7  ;;  %s144_s26 = sshll.u32 %s1467_s2, 4  ;;  %s145_s26 = int_to_ptr.vmem [resolvable:$true] %s144_s26 }
   0xf   : > { %s1063_s28 = sadd.s32 1, %s973_s15   ;;  %s839_s30 = scalar_lea.vmem %s134_s22, 16 }
  0x10   : > { %s1474_s23 = scalar_select %p1046_p8, 1, 0 }
  0x11   : > { %p774_p10 = pneg %p1046_p8  ;;  %s25_s29 = ssub.s32 %s973_s15, %s1063_s28 }
  0x12   : > { %p840_p12 = scmp.ne.s32.totalorder %s134_s22, %s839_s30  ;;  %p847_p5 = scmp.lt.s32.totalorder %s134_s22, %s134_s22 }
  0x13   : > { %p1058_p11 = pnand %p774_p10, %p1469_p1  ;;  %p848_p7 = scmp.lt.s32.totalorder %s839_s30, %s839_s30 }
  0x15   : > { %p841_p13 = pneg %p1058_p11  ;;  %p849_p9 = por %p848_p7, %p847_p5 }
  0x17   : > { %p842_p0 = pnand %p841_p13, %p840_p12 }
  0x19   : > { %p843_p3 = pneg %p842_p0 }
  0x1b   : > { %p850_p2 = pnand %p849_p9, %p843_p3 }
  0x1d   : > { %853 = shalt.err (!%p850_p2)
}
  0x1e   : > { %s975_s4 = smov [#allocation7]   ;;  %s854_s5 = scalar_lea.vmem %s145_s26, 16 }
  0x1f   : > { %777 = dma.vmem_to_smem (!%p1058_p11), %s134_s22, 16, %s975_s4, [#allocation6]  }
  0x20   : > { %p855_p10 = scmp.ne.s32.totalorder %s145_s26, %s854_s5  ;;  %p862_p4 = scmp.lt.s32.totalorder %s145_s26, %s145_s26 }
  0x21   : > { %p863_p8 = scmp.lt.s32.totalorder %s854_s5, %s854_s5 }
  0x22   : > { %p857_p1 = pnand %p855_p10, %p841_p13 }
  0x23   : > { %p864_p12 = por %p863_p8, %p862_p4 }
  0x24   : > { %p858_p6 = pneg %p857_p1 }
  0x26   : > { %p865_p0 = pnand %p864_p12, %p858_p6 }
  0x28   : > { %868 = shalt.err (!%p865_p0)
}
  0x29   : > { %s976_s6 = smov [#allocation8]   ;;  %p26_p2 = scmp.eq.s32.totalorder %s25_s29, 0 }
  0x2a   : > { %780 = dma.vmem_to_smem (!%p1058_p11), %s145_s26, 16, %s976_s6, [#allocation9]  }
  0x2b   : > { %s28_s7 = sadd.s32 1, %s969_s14  ;;  %p35_p1 = scmp.ne.s32.totalorder %s969_s14, %s965_s13 }
  0x2c   : > { %p36_p9 = scmp.eq.s32.totalorder %s973_s15, 0  ;;  %p1476_p6 = scmp.eq.s32.totalorder %s1024_s16, 1 }
  0x2d   : > { %s1078_s8 = scalar_select %p26_p2, %s969_s14, %s28_s7  }
  0x2e   : > { %p37_p4 = por %p36_p9, %p35_p1  ;;  %p1082_p8 = por %p1476_p6, %p35_p1 }
  0x2f   : > { %p791_p13 = scmp.lt.s32.totalorder %s973_s15, 2  ;;  %s155_s10 = sand.u32 1, %s969_s14  }
  0x30   : > { %s723_s11 = sshll.u32 %s155_s10, 3  ;;  %s724_s17 = sshll.u32 %s973_s15, 7 }
  0x31   : > { %s1092_s22 = scalar_lea.hbm %s1465_s0, %s724_s17  ;;  %s159_s24 = scalar_lea.vmem [#allocation3], %s723_s11 }
  0x32   : > { %s166_s25 = sshll.u32 %s159_s24, 4  ;;  %p1096_p11 = pnand %p791_p13, %p37_p4  ;;  %s1094_s25 = int_to_ptr.vmem [resolvable:$true] %s166_s25 }
  0x33   : > { %s156_s27 = scalar_lea.sflag [#allocation4], %s155_s10  ;;  %s869_s29 = scalar_lea.hbm %s1092_s22, 128 }
  0x34   : > { %p870_p3 = scmp.ne.s32.totalorder %s1092_s22, %s869_s29  ;;  %p871_p5 = pneg %p1096_p11 }
  0x35   : > { %s874_s5 = scalar_lea.hbm %s1465_s0, 256  ;;  %p875_p12 = scmp.lt.u32.totalorder %s1092_s22, %s1465_s0 }
  0x36   : > { %p872_p7 = pnand %p871_p5, %p870_p3  ;;  %p876_p0 = scmp.lt.u32.totalorder %s874_s5, %s869_s29 }
  0x37   : > { %p878_p1 = scmp.lt.u32.totalorder %s869_s29, %s1092_s22 }
  0x38   : > { %p873_p10 = pneg %p872_p7  ;;  %p877_p2 = por %p876_p0, %p875_p12 }
  0x3a   : > { %p879_p9 = por %p878_p1, %p877_p2 }
  0x3c   : > { %p880_p4 = pnand %p879_p9, %p873_p10 }
  0x3e   : > { %883 = shalt.err (!%p880_p4)
}
  0x3f   : > { %s884_s10 = scalar_lea.vmem %s1094_s25, 128  ;;  %s977_s11 = smov [#allocation3]  }
  0x40   : > { %p885_p6 = scmp.ne.s32.totalorder %s1094_s25, %s884_s10  ;;  %s889_s17 = sshll.u32 %s977_s11, 4  ;;  %s890_s17 = int_to_ptr.vmem [resolvable:$false] %s889_s17 }
  0x41   : > { %s891_s20 = scalar_lea.vmem %s890_s17, 256  ;;  %p892_p7 = scmp.lt.s32.totalorder %s1094_s25, %s890_s17 }
  0x42   : > { %p887_p13 = pnand %p885_p6, %p871_p5  ;;  %p893_p12 = scmp.lt.s32.totalorder %s891_s20, %s884_s10 }
  0x44   : > { %p888_p3 = pneg %p887_p13  ;;  %p894_p0 = por %p893_p12, %p892_p7 }
  0x46   : > { %p895_p2 = pnand %p894_p0, %p888_p3 }
  0x48   : > { %898 = shalt.err (!%p895_p2)
}
  0x49   : > { %784 = dma.hbm_to_vmem [thread:$0]  (!%p1096_p11), %s1092_s22, 128, %s1094_s25, %s156_s27  }
  0x4a   : > { %p1479_p10 = scmp.ne.s32.totalorder %s1474_s23, 0 }
  0x4b   : > { %s1128_s21 = sand.u32 (!%p1479_p10), 1, %s965_s13   ;;  %p1480_p5 = scmp.ne.s32.totalorder (!%p1479_p10), %s1472_s18, 0 }
  0x4c   : > { %175 = sbr.rel (%p1479_p10) target bundleno = 259 (0x103), region = 32  ;;  %s726_s24 = sshll.u32 (!%p1479_p10), %s1128_s21, 3 }
  0x4d   : > { %s178_s29 = scalar_lea.sflag (!%p1479_p10), [#allocation4], %s1128_s21  ;;  %s181_s30 = scalar_lea.vmem (!%p1479_p10), [#allocation3], %s726_s24 }
  0x53   : > { %944 = dma.done.wait (%p1480_p5), %s178_s29, 128  }
  0x54   : > { %946 = vsyncadd (%p1480_p5), %s178_s29, 4294967168  ;;  %p1481_p1 = scmp.eq.s32.totalorder %s1024_s16, 0 }
  0x56   : > { %948 = dma.done.wait (%p1481_p1), [#allocation6], 16   ;;  %p1482_p11 = pmov %p1481_p1 }
  0x57   : > { %p1483_p9 = pmov %p1481_p1 }
  0x58   : > { %950 = vsyncadd (%p1482_p11), [#allocation6], 4294967280 }
  0x59   : > { %952 = dma.done.wait (%p1483_p9), [#allocation9], 16   ;;  %p1484_p4 = pmov %p1481_p1 }
  0x5b   : > { %954 = vsyncadd (%p1484_p4), [#allocation9], 4294967280 }
  0x5c   : > { %194 = sfence }
  0x5d   : > { %v1144_v0 = vld [vmem:[%s181_s30] sm:$0xff]  ;;  %s219_s23 = sld [smem:[#allocation7]]  ;;  %s739_s22 = sld [smem:[#allocation7 + $0x3]]  ;;  %v978_v1 = vmov 0.0   ;;  %v243_v9 = vlaneseq  ;;  %vm248_vm0 = vcmask 1041408  }
  0x5e   : > { %213 = vst [vmem:[#allocation2] sm:$0x3] %v978_v1  ;;  %214 = vst [vmem:[#allocation2 + $0xa] sm:$0x3] %v978_v1  ;;  %s1149_s18 = sld [smem:[#allocation7 + $0x6]]  ;;  %s1151_s25 = sld [smem:[#allocation8]] }
  0x5f   : > { %216 = vst [vmem:[#allocation2 + $0x2] sm:$0xff] %v1144_v0  ;;  %s1153_s26 = sld [smem:[#allocation7 + $0x1]]  ;;  %s1155_s27 = sld [smem:[#allocation7 + $0x2]] }
  0x60   : > { %s1157_s4 = sld [smem:[#allocation8 + $0x1]]  ;;  %s1159_s5 = sld [smem:[#allocation7 + $0x4]] }
  0x61   : > { %s1161_s6 = sld [smem:[#allocation7 + $0x5]]  ;;  %s1164_s7 = sld [smem:[#allocation8 + $0x2]] }
  0x62   : > { %s1166_s10 = sld [smem:[#allocation7 + $0x7]]  ;;  %s1169_s11 = sld [smem:[#allocation7 + $0x8]] }
  0x63   : > { %v222_v2 = vstv %s219_s23  ;;  %v357_v3 = vstv %s739_s22  ;;  %s729_s17 = sshll.u32 %s1128_s21, 4  ;;  %s759_s29 = sshll.u32 %s1024_s16, 7 }
  0x64   : > { %v486_v4 = vstv %s1149_s18  ;;  %v218_v8 = vstv %s1151_s25  ;;  %s212_s20 = scalar_lea.vmem [#allocation10], %s729_s17  ;;  %s1421_s22 = scalar_lea.hbm %s1468_s3, %s759_s29 }
  0x65   : > { %v230_v18 = vstv %s1153_s26  ;;  %v237_v19 = vld [vmem:[#allocation2 + $0xa] sm:$0x3]  ;;  %v238_v20 = vstv %s1155_s27  ;;  %s623_s24 = sshll.u32 %s212_s20, 4  ;;  %s611_s18 = scalar_lea.sflag [#allocation5], %s1128_s21  ;;  %s1416_s24 = int_to_ptr.vmem [resolvable:$true] %s623_s24 }
  0x66   : > { %v220_v5 = vld [vmem:[#allocation2] sm:$0xff]  ;;  %v221_v6 = vld [vmem:[#allocation2 + $0x8] sm:$0x3]  ;;  %v353_v21 = vstv %s1157_s4  ;;  %v239_v28 = vmul.f32 %v238_v20, %v1144_v0  ;;  %v240_v29 = vmul.f32 %v238_v20, %v237_v19  ;;  %v372_v31 = vld [vmem:[#allocation2 + $0xa] sm:$0x3]  ;;  %v365_v34 = vstv %s1159_s5  ;;  %s899_s25 = scalar_lea.vmem %s1416_s24, 256 }
  0x67   : > { %v228_v7 = vld [vmem:[#allocation2 + $0x1] sm:$0xff]  ;;  %v223_v10 = vmul.f32 %v222_v2, %v220_v5  ;;  %v224_v11 = vmul.f32 %v222_v2, %v221_v6  ;;  %v229_v12 = vld [vmem:[#allocation2 + $0x9] sm:$0x3]  ;;  %v358_v14 = vmul.f32 %v357_v3, %v220_v5  ;;  %v487_v15 = vmul.f32 %v486_v4, %v220_v5  ;;  %p900_p6 = scmp.ne.s32.totalorder %s1416_s24, %s899_s25  ;;  %s979_s26 = smov [#allocation10]  }
  0x68   : > { %v356_v13 = vld [vmem:[#allocation2 + $0x8] sm:$0x3]  ;;  %v231_v26 = vmul.f32 %v230_v18, %v228_v7  ;;  %v232_v27 = vmul.f32 %v230_v18, %v229_v12  ;;  %v373_v35 = vstv %s1161_s6  ;;  %v366_v38 = vmul.f32 %v365_v34, %v228_v7  ;;  %v501_v49 = vld [vmem:[#allocation2 + $0xa] sm:$0x3]  ;;  %s903_s16 = sshll.u32 %s979_s26, 4  ;;  %s904_s16 = int_to_ptr.vmem [resolvable:$false] %s903_s16 }
  0x69   : > { %v359_v16 = vmul.f32 %v357_v3, %v356_v13  ;;  %v485_v17 = vld [vmem:[#allocation2 + $0x8] sm:$0x3]  ;;  %v225_v24 = vadd.f32 %v223_v10, %v218_v8  ;;  %v226_v25 = vadd.f32 %v224_v11, %v218_v8  ;;  %v360_v30 = vadd.f32 %v358_v14, %v353_v21  ;;  %p901_p13 = pnand %p900_p6, %p1082_p8  ;;  %s905_s27 = scalar_lea.vmem %s904_s16, 512 }
  0x6a   : > { %v364_v22 = vld [vmem:[#allocation2 + $0x9] sm:$0x3]  ;;  %v488_v23 = vmul.f32 %v486_v4, %v485_v17  ;;  %v374_v40 = vmul.f32 %v373_v35, %v1144_v0  ;;  %v375_v42 = vmul.f32 %v373_v35, %v372_v31  ;;  %v482_v43 = vstv %s1164_s7  ;;  %p906_p7 = scmp.lt.s32.totalorder %s1416_s24, %s904_s16  ;;  %p907_p12 = scmp.lt.s32.totalorder %s905_s27, %s899_s25 }
  0x6b   : > { %v233_v32 = vadd.f32 %v231_v26, %v225_v24  ;;  %v361_v33 = vadd.f32 %v359_v16, %v353_v21  ;;  %v493_v36 = vld [vmem:[#allocation2 + $0x9] sm:$0x3]  ;;  %v234_v37 = vadd.f32 %v232_v27, %v226_v25  ;;  %v367_v39 = vmul.f32 %v365_v34, %v364_v22  ;;  %p902_p3 = pneg %p901_p13 }
  0x6c   : > { %v494_v44 = vstv %s1166_s10  ;;  %v368_v46 = vadd.f32 %v366_v38, %v360_v30  ;;  %v489_v48 = vadd.f32 %v487_v15, %v482_v43  ;;  %v490_v50 = vadd.f32 %v488_v23, %v482_v43  ;;  %p908_p0 = por %p907_p12, %p906_p7 }
  0x6d   : > { %v1178_v41 = vadd.f32 %v239_v28, %v233_v32  ;;  %v1182_v45 = vadd.f32 %v240_v29, %v234_v37  ;;  %v369_v47 = vadd.f32 %v367_v39, %v361_v33  ;;  %v495_v51 = vmul.f32 %v494_v44, %v228_v7 }
  0x6e   : > { %v496_v52 = vmul.f32 %v494_v44, %v493_v36  ;;  %v502_v53 = vstv %s1169_s11  ;;  %v1187_v55 = vadd.f32 %v374_v40, %v368_v46  ;;  %v244_v5 = vshrl.u32 %v243_v9, 7  ;;  %p909_p2 = pnand %p908_p0, %p902_p3 }
  0x6f   : > { %v249_v54 = vsel %vm248_vm0, %v1182_v45, -inf  ;;  %v1189_v56 = vadd.f32 %v375_v42, %v369_v47  ;;  %v503_v57 = vmul.f32 %v502_v53, %v1144_v0  ;;  %v497_v59 = vadd.f32 %v495_v51, %v489_v48 }
  0x70   : > { %v250_v58 = vmax.f32 %v1178_v41, %v249_v54  ;;  %v498_v60 = vadd.f32 %v496_v52, %v490_v50  ;;  %v504_v61 = vmul.f32 %v502_v53, %v501_v49  ;;  %v245_v12 = vadd.s32 8, %v244_v5 }
  0x71   : > { %v378_v62 = vsel %vm248_vm0, %v1189_v56, -inf  ;;  %v1196_v3 = vadd.f32 %v503_v57, %v497_v59  ;;  %v1203_v19 = vcvt.s32.f32 %v244_v5 }
  0x72   : > { %v251_v63 = vrot.slane %v250_v58, 4  ;;  %v379_v2 = vmax.f32 %v1187_v55, %v378_v62  ;;  %v1198_v4 = vadd.f32 %v504_v61, %v498_v60  ;;  %v1205_v20 = vcvt.s32.f32 %v245_v12 }
  0x74   : > { %v252_v6 = vmax.f32 %v250_v58, %v251_v63  ;;  %v380_v7 = vrot.slane %v379_v2, 4  ;;  %v507_v0 = vsel %vm248_vm0, %v1198_v4, -inf }
  0x75   : > { %v508_v8 = vmax.f32 %v1196_v3, %v507_v0 }
  0x76   : > { %v253_v10 = vrot.slane %v252_v6, 2  ;;  %v381_v11 = vmax.f32 %v379_v2, %v380_v7 }
  0x77   : > { %v509_v13 = vrot.slane %v508_v8, 4 }
  0x78   : > { %v254_v14 = vmax.f32 %v252_v6, %v253_v10  ;;  %v382_v15 = vrot.slane %v381_v11, 2 }
  0x79   : > { %v510_v16 = vmax.f32 %v508_v8, %v509_v13 }
  0x7a   : > { %v255_v17 = vrot.slane %v254_v14, 1  ;;  %v383_v18 = vmax.f32 %v381_v11, %v382_v15 }
  0x7b   : > { %v511_v9 = vrot.slane %v510_v16, 2 }
  0x7c   : > { %v1207_v21 = vmax.f32 %v254_v14, %v255_v17  ;;  %v384_v22 = vrot.slane %v383_v18, 1 }
  0x7d   : > { %v512_v23 = vmax.f32 %v510_v16, %v511_v9 }
  0x7e   : > { %vm257_vm1 = vcmp.eq.f32.partialorder %v1178_v41, %v1207_v21  ;;  %vm258_vm2 = vcmp.eq.f32.partialorder %v1182_v45, %v1207_v21  ;;  %v1213_v24 = vmax.f32 %v383_v18, %v384_v22 }
  0x7f   : > { %v259_v25 = vsel %vm257_vm1, %v1203_v19, 10.0  ;;  %v260_v26 = vsel %vm258_vm2, %v1205_v20, 10.0  ;;  %v513_v27 = vrot.slane %v512_v23, 1 }
  0x80   : > { %v261_v28 = vsel %vm248_vm0, %v260_v26, inf  ;;  %vm386_vm3 = vcmp.eq.f32.partialorder %v1187_v55, %v1213_v24  ;;  %vm387_vm4 = vcmp.eq.f32.partialorder %v1189_v56, %v1213_v24 }
  0x81   : > { %v262_v29 = vmin.f32 %v259_v25, %v261_v28  ;;  %v388_v30 = vsel %vm386_vm3, %v1203_v19, 10.0  ;;  %v389_v31 = vsel %vm387_vm4, %v1205_v20, 10.0  ;;  %v1224_v32 = vmax.f32 %v512_v23, %v513_v27 }
  0x82   : > { %v390_v33 = vsel %vm248_vm0, %v389_v31, inf }
  0x83   : > { %v263_v34 = vrot.slane %v262_v29, 4  ;;  %v391_v35 = vmin.f32 %v388_v30, %v390_v33  ;;  %vm515_vm5 = vcmp.eq.f32.partialorder %v1196_v3, %v1224_v32  ;;  %vm516_vm6 = vcmp.eq.f32.partialorder %v1198_v4, %v1224_v32 }
  0x84   : > { %v517_v36 = vsel %vm515_vm5, %v1203_v19, 10.0  ;;  %v518_v37 = vsel %vm516_vm6, %v1205_v20, 10.0 }
  0x85   : > { %v264_v38 = vmin.f32 %v262_v29, %v263_v34  ;;  %v392_v39 = vrot.slane %v391_v35, 4  ;;  %v519_v40 = vsel %vm248_vm0, %v518_v37, inf }
  0x86   : > { %v520_v42 = vmin.f32 %v517_v36, %v519_v40 }
  0x87   : > { %v265_v43 = vrot.slane %v264_v38, 2  ;;  %v393_v44 = vmin.f32 %v391_v35, %v392_v39 }
  0x88   : > { %v521_v46 = vrot.slane %v520_v42, 4 }
  0x89   : > { %v266_v47 = vmin.f32 %v264_v38, %v265_v43  ;;  %v394_v48 = vrot.slane %v393_v44, 2 }
  0x8a   : > { %v522_v49 = vmin.f32 %v520_v42, %v521_v46 }
  0x8b   : > { %v267_v50 = vrot.slane %v266_v47, 1  ;;  %v395_v51 = vmin.f32 %v393_v44, %v394_v48 }
  0x8c   : > { %v523_v52 = vrot.slane %v522_v49, 2 }
  0x8d   : > { %v1234_v53 = vmin.f32 %v266_v47, %v267_v50  ;;  %v396_v54 = vrot.slane %v395_v51, 1 }
  0x8e   : > { %v524_v57 = vmin.f32 %v522_v49, %v523_v52 }
  0x8f   : > { %vm269_vm7 = vcmp.eq.f32.partialorder %v1203_v19, %v1234_v53  ;;  %vm270_vm8 = vcmp.eq.f32.partialorder %v1205_v20, %v1234_v53  ;;  %v1240_v58 = vmin.f32 %v395_v51, %v396_v54 }
  0x90   : > { %v1243_v59 = vsel %vm269_vm7, -inf, %v1178_v41  ;;  %v1246_v60 = vsel %vm270_vm8, -inf, %v1182_v45  ;;  %v525_v61 = vrot.slane %v524_v57, 1 }
  0x91   : > { %v273_v62 = vsel %vm248_vm0, %v1246_v60, -inf  ;;  %vm398_vm9 = vcmp.eq.f32.partialorder %v1203_v19, %v1240_v58  ;;  %vm399_vm10 = vcmp.eq.f32.partialorder %v1205_v20, %v1240_v58 }
  0x92   : > { %v274_v63 = vmax.f32 %v1243_v59, %v273_v62  ;;  %v1256_v2 = vsel %vm398_vm9, -inf, %v1187_v55  ;;  %v1259_v41 = vsel %vm399_vm10, -inf, %v1189_v56  ;;  %v1261_v45 = vmin.f32 %v524_v57, %v525_v61 }
  0x93   : > { %v402_v5 = vsel %vm248_vm0, %v1259_v41, -inf }
  0x94   : > { %v275_v6 = vrot.slane %v274_v63, 4  ;;  %v403_v7 = vmax.f32 %v1256_v2, %v402_v5  ;;  %vm527_vm11 = vcmp.eq.f32.partialorder %v1203_v19, %v1261_v45  ;;  %vm528_vm12 = vcmp.eq.f32.partialorder %v1205_v20, %v1261_v45 }
  0x95   : > { %v1271_v55 = vsel %vm527_vm11, -inf, %v1196_v3  ;;  %v1274_v56 = vsel %vm528_vm12, -inf, %v1198_v4 }
  0x96   : > { %v276_v0 = vmax.f32 %v274_v63, %v275_v6  ;;  %v404_v8 = vrot.slane %v403_v7, 4  ;;  %v531_v10 = vsel %vm248_vm0, %v1274_v56, -inf }
  0x97   : > { %v532_v11 = vmax.f32 %v1271_v55, %v531_v10 }
  0x98   : > { %v277_v12 = vrot.slane %v276_v0, 2  ;;  %v405_v13 = vmax.f32 %v403_v7, %v404_v8 }
  0x99   : > { %v533_v14 = vrot.slane %v532_v11, 4 }
  0x9a   : > { %v278_v15 = vmax.f32 %v276_v0, %v277_v12  ;;  %v406_v16 = vrot.slane %v405_v13, 2 }
  0x9b   : > { %v534_v17 = vmax.f32 %v532_v11, %v533_v14 }
  0x9c   : > { %v279_v18 = vrot.slane %v278_v15, 1  ;;  %v407_v9 = vmax.f32 %v405_v13, %v406_v16 }
  0x9d   : > { %v535_v3 = vrot.slane %v534_v17, 2 }
  0x9e   : > { %v1279_v22 = vmax.f32 %v278_v15, %v279_v18  ;;  %v408_v4 = vrot.slane %v407_v9, 1 }
  0x9f   : > { %v536_v23 = vmax.f32 %v534_v17, %v535_v3 }
  0xa0   : > { %vm281_vm13 = vcmp.eq.f32.partialorder %v1243_v59, %v1279_v22  ;;  %vm282_vm14 = vcmp.eq.f32.partialorder %v1246_v60, %v1279_v22  ;;  %v1285_v25 = vmax.f32 %v407_v9, %v408_v4 }
  0xa1   : > { %v283_v26 = vsel %vm281_vm13, %v1203_v19, 10.0  ;;  %v284_v27 = vsel %vm282_vm14, %v1205_v20, 10.0  ;;  %v537_v28 = vrot.slane %v536_v23, 1 }
  0xa2   : > { %v285_v29 = vsel %vm248_vm0, %v284_v27, inf  ;;  %vm410_vm15 = vcmp.eq.f32.partialorder %v1256_v2, %v1285_v25  ;;  %vm411_vm1 = vcmp.eq.f32.partialorder %v1259_v41, %v1285_v25 }
  0xa3   : > { %v286_v30 = vmin.f32 %v283_v26, %v285_v29  ;;  %v412_v31 = vsel %vm410_vm15, %v1203_v19, 10.0  ;;  %v413_v33 = vsel %vm411_vm1, %v1205_v20, 10.0  ;;  %v1296_v34 = vmax.f32 %v536_v23, %v537_v28 }
  0xa4   : > { %v414_v35 = vsel %vm248_vm0, %v413_v33, inf }
  0xa5   : > { %v287_v36 = vrot.slane %v286_v30, 4  ;;  %v415_v37 = vmin.f32 %v412_v31, %v414_v35  ;;  %vm539_vm2 = vcmp.eq.f32.partialorder %v1271_v55, %v1296_v34  ;;  %vm540_vm3 = vcmp.eq.f32.partialorder %v1274_v56, %v1296_v34 }
  0xa6   : > { %v541_v38 = vsel %vm539_vm2, %v1203_v19, 10.0  ;;  %v542_v39 = vsel %vm540_vm3, %v1205_v20, 10.0 }
  0xa7   : > { %v288_v40 = vmin.f32 %v286_v30, %v287_v36  ;;  %v416_v42 = vrot.slane %v415_v37, 4  ;;  %v543_v43 = vsel %vm248_vm0, %v542_v39, inf }
  0xa8   : > { %v544_v44 = vmin.f32 %v541_v38, %v543_v43 }
  0xa9   : > { %v289_v46 = vrot.slane %v288_v40, 2  ;;  %v417_v47 = vmin.f32 %v415_v37, %v416_v42 }
  0xaa   : > { %v545_v48 = vrot.slane %v544_v44, 4 }
  0xab   : > { %v290_v49 = vmin.f32 %v288_v40, %v289_v46  ;;  %v418_v50 = vrot.slane %v417_v47, 2 }
  0xac   : > { %v546_v51 = vmin.f32 %v544_v44, %v545_v48 }
  0xad   : > { %v291_v52 = vrot.slane %v290_v49, 1  ;;  %v419_v54 = vmin.f32 %v417_v47, %v418_v50 }
  0xae   : > { %v547_v57 = vrot.slane %v546_v51, 2 }
  0xaf   : > { %v1306_v61 = vmin.f32 %v290_v49, %v291_v52  ;;  %v420_v62 = vrot.slane %v419_v54, 1 }
  0xb0   : > { %v548_v63 = vmin.f32 %v546_v51, %v547_v57 }
  0xb1   : > { %vm293_vm4 = vcmp.eq.f32.partialorder %v1203_v19, %v1306_v61  ;;  %vm294_vm5 = vcmp.eq.f32.partialorder %v1205_v20, %v1306_v61  ;;  %v1315_v0 = vmin.f32 %v419_v54, %v420_v62  ;;  %vm317_vm1 = vcmp.lt.f32.partialorder %v1306_v61, %v1234_v53 }
  0xb2   : > { %v295_v5 = vsel %vm293_vm4, -inf, %v1243_v59  ;;  %v296_v6 = vsel %vm294_vm5, -inf, %v1246_v60  ;;  %v549_v8 = vrot.slane %v548_v63, 1  ;;  %vm328_vm2 = vcmp.lt.f32.partialorder %v1234_v53, %v1306_v61 }
  0xb3   : > { %v297_v7 = vsel %vm248_vm0, %v296_v6, -inf  ;;  %vm422_vm6 = vcmp.eq.f32.partialorder %v1203_v19, %v1315_v0  ;;  %vm423_vm7 = vcmp.eq.f32.partialorder %v1205_v20, %v1315_v0  ;;  %vm457_vm3 = vcmp.lt.f32.partialorder %v1240_v58, %v1315_v0 }
  0xb4   : > { %v298_v10 = vmax.f32 %v295_v5, %v297_v7  ;;  %v424_v12 = vsel %vm422_vm6, -inf, %v1256_v2  ;;  %v425_v13 = vsel %vm423_vm7, -inf, %v1259_v41  ;;  %v1324_v60 = vmin.f32 %v548_v63, %v549_v8 }
  0xb5   : > { %v426_v59 = vsel %vm248_vm0, %v425_v13, -inf }
  0xb6   : > { %v299_v11 = vrot.slane %v298_v10, 4  ;;  %v427_v15 = vmax.f32 %v424_v12, %v426_v59  ;;  %vm551_vm8 = vcmp.eq.f32.partialorder %v1203_v19, %v1324_v60  ;;  %vm552_vm9 = vcmp.eq.f32.partialorder %v1205_v20, %v1324_v60 }
  0xb7   : > { %v553_v18 = vsel %vm551_vm8, -inf, %v1271_v55  ;;  %v554_v2 = vsel %vm552_vm9, -inf, %v1274_v56 }
  0xb8   : > { %v300_v14 = vmax.f32 %v298_v10, %v299_v11  ;;  %v428_v17 = vrot.slane %v427_v15, 4  ;;  %v555_v41 = vsel %vm248_vm0, %v554_v2, -inf  ;;  %v732_v10 = vsel %vm317_vm1, 1.0, %v978_v1 }
  0xb9   : > { %v556_v4 = vmax.f32 %v553_v18, %v555_v41  ;;  %vm586_vm1 = vcmp.lt.f32.partialorder %v1261_v45, %v1324_v60 }
  0xba   : > { %v301_v16 = vrot.slane %v300_v14, 2  ;;  %v429_v3 = vmax.f32 %v427_v15, %v428_v17 }
  0xbb   : > { %v557_v27 = vrot.slane %v556_v4, 4 }
  0xbc   : > { %v302_v9 = vmax.f32 %v300_v14, %v301_v16  ;;  %v430_v26 = vrot.slane %v429_v3, 2 }
  0xbd   : > { %v558_v30 = vmax.f32 %v556_v4, %v557_v27 }
  0xbe   : > { %v303_v23 = vrot.slane %v302_v9, 1  ;;  %v431_v29 = vmax.f32 %v429_v3, %v430_v26 }
  0xbf   : > { %v559_v55 = vrot.slane %v558_v30, 2 }
  0xc0   : > { %v1333_v28 = vmax.f32 %v302_v9, %v303_v23  ;;  %v432_v31 = vrot.slane %v431_v29, 1  ;;  %v744_v9 = vsel %vm457_vm3, 1.0, %v978_v1 }
  0xc1   : > { %v560_v37 = vmax.f32 %v558_v30, %v559_v55 }
  0xc2   : > { %vm305_vm10 = vcmp.eq.f32.partialorder %v295_v5, %v1333_v28  ;;  %vm306_vm11 = vcmp.eq.f32.partialorder %v296_v6, %v1333_v28  ;;  %v1340_v36 = vmax.f32 %v431_v29, %v432_v31 }
  0xc3   : > { %v307_v56 = vsel %vm305_vm10, %v1203_v19, 10.0  ;;  %v308_v33 = vsel %vm306_vm11, %v1205_v20, 10.0  ;;  %v561_v39 = vrot.slane %v560_v37, 1 }
  0xc4   : > { %v309_v35 = vsel %vm248_vm0, %v308_v33, inf  ;;  %vm434_vm12 = vcmp.eq.f32.partialorder %v424_v12, %v1340_v36  ;;  %vm435_vm13 = vcmp.eq.f32.partialorder %v425_v13, %v1340_v36 }
  0xc5   : > { %v310_v38 = vmin.f32 %v307_v56, %v309_v35  ;;  %v436_v42 = vsel %vm434_vm12, %v1203_v19, 10.0  ;;  %v437_v43 = vsel %vm435_vm13, %v1205_v20, 10.0  ;;  %v1347_v46 = vmax.f32 %v560_v37, %v561_v39 }
  0xc6   : > { %v438_v44 = vsel %vm248_vm0, %v437_v43, inf }
  0xc7   : > { %v311_v40 = vrot.slane %v310_v38, 4  ;;  %v439_v48 = vmin.f32 %v436_v42, %v438_v44  ;;  %vm563_vm14 = vcmp.eq.f32.partialorder %v553_v18, %v1347_v46  ;;  %vm564_vm15 = vcmp.eq.f32.partialorder %v554_v2, %v1347_v46 }
  0xc8   : > { %v565_v51 = vsel %vm563_vm14, %v1203_v19, 10.0  ;;  %v566_v52 = vsel %vm564_vm15, %v1205_v20, 10.0  ;;  %v734_v20 = vsel %vm328_vm2, 1.0, %v978_v1  ;;  %vm575_vm15 = vcmp.lt.f32.partialorder %v1324_v60, %v1261_v45 }
  0xc9   : > { %v312_v47 = vmin.f32 %v310_v38, %v311_v40  ;;  %v440_v50 = vrot.slane %v439_v48, 4  ;;  %v567_v54 = vsel %vm248_vm0, %v566_v52, inf  ;;  %vm446_vm0 = vcmp.lt.f32.partialorder %v1315_v0, %v1240_v58 }
  0xca   : > { %v568_v63 = vmin.f32 %v565_v51, %v567_v54  ;;  %v742_v41 = vsel %vm446_vm0, 1.0, %v978_v1  ;;  %v752_v39 = vsel %vm575_vm15, 1.0, %v978_v1  ;;  %v754_v40 = vsel %vm586_vm1, 1.0, %v978_v1 }
  0xcb   : > { %v313_v49 = vrot.slane %v312_v47, 2  ;;  %v441_v62 = vmin.f32 %v439_v48, %v440_v50 }
  0xcc   : > { %v569_v7 = vrot.slane %v568_v63, 4 }
  0xcd   : > { %v314_v57 = vmin.f32 %v312_v47, %v313_v49  ;;  %v442_v6 = vrot.slane %v441_v62, 2 }
  0xce   : > { %v570_v12 = vmin.f32 %v568_v63, %v569_v7 }
  0xcf   : > { %v315_v5 = vrot.slane %v314_v57, 1  ;;  %v443_v11 = vmin.f32 %v441_v62, %v442_v6 }
  0xd0   : > { %v571_v3 = vrot.slane %v570_v12, 2 }
  0xd1   : > { %v316_v8 = vmin.f32 %v314_v57, %v315_v5  ;;  %v444_v2 = vrot.slane %v443_v11, 1 }
  0xd2   : > { %v572_v26 = vmin.f32 %v570_v12, %v571_v3 }
  0xd3   : > { %vm321_vm4 = vcmp.lt.f32.partialorder %v316_v8, %v1234_v53  ;;  %vm332_vm5 = vcmp.lt.f32.partialorder %v316_v8, %v1306_v61  ;;  %vm339_vm6 = vcmp.lt.f32.partialorder %v1234_v53, %v316_v8  ;;  %vm343_vm7 = vcmp.lt.f32.partialorder %v1306_v61, %v316_v8 }
  0xd4   : > { %v733_v13 = vsel %vm321_vm4, 1.0, %v978_v1  ;;  %v735_v59 = vsel %vm332_vm5, 1.0, %v978_v1  ;;  %v736_v14 = vsel %vm339_vm6, 1.0, %v978_v1  ;;  %v737_v15 = vsel %vm343_vm7, 1.0, %v978_v1 }
  0xd5   : > { %v324_v16 = vadd.f32 %v733_v13, %v732_v10  ;;  %v335_v17 = vadd.f32 %v735_v59, %v734_v20  ;;  %v346_v18 = vadd.f32 %v737_v15, %v736_v14  ;;  %v445_v53 = vmin.f32 %v443_v11, %v444_v2 }
  0xd6   : > { %v573_v33 = vrot.slane %v572_v26, 1 }
  0xd7   : > { %vm325_vm8 = vcmp.eq.f32.partialorder %v1203_v19, %v324_v16  ;;  %vm336_vm9 = vcmp.eq.f32.partialorder %v1203_v19, %v335_v17  ;;  %vm347_vm10 = vcmp.eq.f32.partialorder %v1203_v19, %v346_v18  ;;  %vm450_vm11 = vcmp.lt.f32.partialorder %v445_v53, %v1240_v58 }
  0xd8   : > { %v326_v61 = vsel %vm325_vm8, %v1207_v21, 0.0  ;;  %v337_v4 = vsel %vm336_vm9, %v1279_v22, 0.0  ;;  %v348_v23 = vsel %vm347_vm10, %v1333_v28, 0.0  ;;  %vm461_vm12 = vcmp.lt.f32.partialorder %v445_v53, %v1315_v0 }
  0xd9   : > { %v338_v27 = vadd.f32 %v337_v4, %v326_v61  ;;  %vm468_vm13 = vcmp.lt.f32.partialorder %v1240_v58, %v445_v53  ;;  %v743_v29 = vsel %vm450_vm11, 1.0, %v978_v1  ;;  %v745_v30 = vsel %vm461_vm12, 1.0, %v978_v1 }
  0xda   : > { %v746_v31 = vsel %vm468_vm13, 1.0, %v978_v1  ;;  %vm472_vm14 = vcmp.lt.f32.partialorder %v1315_v0, %v445_v53  ;;  %v453_v22 = vadd.f32 %v743_v29, %v742_v41  ;;  %v464_v55 = vadd.f32 %v745_v30, %v744_v9 }
  0xdb   : > { %v349_v21 = vadd.f32 %v348_v23, %v338_v27  ;;  %v747_v28 = vsel %vm472_vm14, 1.0, %v978_v1  ;;  %v574_v35 = vmin.f32 %v572_v26, %v573_v33 }
  0xdc   : > { %v475_v56 = vadd.f32 %v747_v28, %v746_v31  ;;  %vm454_vm2 = vcmp.eq.f32.partialorder %v1203_v19, %v453_v22  ;;  %vm465_vm0 = vcmp.eq.f32.partialorder %v1203_v19, %v464_v55 }
  0xdd   : > { %833 = vtanh.f32 %v349_v21  ;;  %v455_v58 = vsel %vm454_vm2, %v1213_v24, 0.0  ;;  %v466_v0 = vsel %vm465_vm0, %v1285_v25, 0.0  ;;  %vm579_vm4 = vcmp.lt.f32.partialorder %v574_v35, %v1261_v45 }
  0xde   : > { %vm476_vm3 = vcmp.eq.f32.partialorder %v1203_v19, %v475_v56  ;;  %v467_v37 = vadd.f32 %v466_v0, %v455_v58  ;;  %vm590_vm5 = vcmp.lt.f32.partialorder %v574_v35, %v1324_v60  ;;  %vm597_vm6 = vcmp.lt.f32.partialorder %v1261_v45, %v574_v35 }
  0xdf   : > { %v477_v38 = vsel %vm476_vm3, %v1340_v36, 0.0  ;;  %vm601_vm7 = vcmp.lt.f32.partialorder %v1324_v60, %v574_v35  ;;  %v753_v25 = vsel %vm579_vm4, 1.0, %v978_v1  ;;  %v755_v42 = vsel %vm590_vm5, 1.0, %v978_v1 }
  0xe0   : > { %v478_v24 = vadd.f32 %v477_v38, %v467_v37  ;;  %v756_v43 = vsel %vm597_vm6, 1.0, %v978_v1  ;;  %v582_v36 = vadd.f32 %v753_v25, %v752_v39  ;;  %v593_v44 = vadd.f32 %v755_v42, %v754_v40 }
  0xe1   : > { %v757_v47 = vsel %vm601_vm7, 1.0, %v978_v1 }
  0xe2   : > { %835 = vtanh.f32 %v478_v24  ;;  %v604_v48 = vadd.f32 %v757_v47, %v756_v43  ;;  %vm583_vm8 = vcmp.eq.f32.partialorder %v1203_v19, %v582_v36  ;;  %vm594_vm9 = vcmp.eq.f32.partialorder %v1203_v19, %v593_v44 }
  0xe3   : > { %v584_v45 = vsel %vm583_vm8, %v1224_v32, 0.0  ;;  %v595_v60 = vsel %vm594_vm9, %v1296_v34, 0.0 }
  0xe4   : > { %vm605_vm10 = vcmp.eq.f32.partialorder %v1203_v19, %v604_v48  ;;  %v596_v49 = vadd.f32 %v595_v60, %v584_v45 }
  0xe5   : > { %v606_v51 = vsel %vm605_vm10, %v1347_v46, 0.0 }
  0xe6   : > { %v607_v1 = vadd.f32 %v606_v51, %v596_v49 }
  0xe7   : > { %v834_v50 = vpop.eup %833 }
  0xe8   : > { %351 = vst [vmem:[%s212_s20] sm:$0x7] %v834_v50  ;;  %837 = vtanh.f32 %v607_v1 }
  0xec   : > { %v836_v52 = vpop.eup %835 }
  0xed   : > { %480 = vst [vmem:[%s212_s20 + $0x3] sm:$0x7] %v836_v52 }
  0xf2   : > { %v838_v19 = vpop.eup %837 }
  0xf3   : > { %609 = vst [vmem:[%s212_s20 + $0x6] sm:$0x7] %v838_v19 }
  0xf4   : > { %912 = shalt.err (!%p909_p2)
}
  0xf5   : > { %s913_s4 = scalar_lea.hbm %s1421_s22, 256  ;;  %s917_s7 = scalar_lea.hbm %s1468_s3, 512 }
  0xf6   : > { %p914_p10 = scmp.ne.s32.totalorder %s1421_s22, %s913_s4  ;;  %p918_p11 = scmp.lt.u32.totalorder %s1421_s22, %s1468_s3 }
  0xf7   : > { %p919_p9 = scmp.lt.u32.totalorder %s917_s7, %s913_s4  ;;  %p921_p6 = scmp.lt.u32.totalorder %s913_s4, %s1421_s22 }
  0xf8   : > { %p915_p5 = pnand %p914_p10, %p1082_p8 }
  0xf9   : > { %p920_p4 = por %p919_p9, %p918_p11 }
  0xfa   : > { %p916_p1 = pneg %p915_p5 }
  0xfb   : > { %p922_p13 = por %p921_p6, %p920_p4 }
  0xfd   : > { %p923_p3 = pnand %p922_p13, %p916_p1 }
  0xff   : > { %926 = shalt.err (!%p923_p3)
}
 0x100   : > { %s980_s17 = smov 128   ;;  %s981_s20 = smov 256  }
 0x101   : > { %s982_s29 = smov 8  }
 0x102   : > { %772 = dma.vmem_to_hbm [thread:$0]  (%p1082_p8), %s1416_s24, 256, %s1421_s22, %s611_s18, %s980_s17, %s981_s20, %s982_s29  }
 0x103 PF: > { %s638_s30 = sand.u32 1, %s961_s12   ;;  %p1485_p7 = scmp.ne.s32.totalorder %s1473_s19, 0 }
 0x104   : > { %p1486_p12 = scmp.ge.s32.totalorder %s973_s15, 2  ;;  %s639_s23 = scalar_lea.sflag [#allocation5], %s638_s30 }
 0x106   : > { %p786_p0 = pnand %p1486_p12, %p1485_p7 }
 0x108   : > { %956 = dma.done.wait (!%p786_p0), %s639_s23, 256  }
 0x109   : > { %958 = vsyncadd (!%p786_p0), %s639_s23, 4294967040  ;;  %p18_p2 = scmp.ge.s32.totalorder %s1063_s28, 4   ;;  %s1487_s12 = smov %s965_s13 }
 0x10a   : > { %s1488_s13 = smov %s969_s14  ;;  %s1489_s14 = smov %s1078_s8 }
 0x10b   : > { %s1490_s15 = smov %s1063_s28  ;;  %20 = sbr.rel (!%p18_p2) target bundleno = 7 (0x7), region = 86 }
 0x112   :  { %644 = vsyncpa [#allocation4], 1 }
 0x113   :  { %646 = vsyncpa [#allocation4 + $0x1], 1 }
 0x114   :  { %647 = vsyncpa [#allocation5], 1 }
 0x115   :  { %649 = vsyncpa [#allocation5 + $0x1], 1 }
 0x116   :  { %650 = vsyncpa [#allocation6], 1 }
 0x117   :  { %652 = vsyncpa [#allocation6 + $0x1], 1 }
 0x118   :  { %653 = vsyncpa [#allocation9], 1 }

</bundles_post_ra>
